<compile_context>
chip_gen: v5e
topology: v5e:2x2
jax: 0.10.0
libtpu: 0.0.40
codegen_flags: <defaults>
</compile_context>

<pallas_src>
import functools

import jax
import jax.numpy as jnp
from jax import lax
from jax.experimental import pallas as pl
from jax.experimental.pallas import tpu as pltpu

LRELU_SLOPE = 0.1
KSIZE = 3
DILATIONS = (1, 3)
# Chained-dilation halo: conv d=1 needs +-1, conv d=3 needs +-3 of conv-1 output.
HALO = sum(d * (KSIZE - 1) // 2 for d in DILATIONS)          # = 4
HALO_FETCH = 8                                               # fetched slab (multiple of 8)


def _round_up(n, m):
    return (n + m - 1) // m * m


def _lrelu(x, slope=LRELU_SLOPE):
    return jnp.where(x > 0, x, slope * x)


def _dilated_conv_im2col(src, w_ref, b_ref, base, d, out_len):
    """3-tap dilated conv as one tall MXU matmul.

    src: (S, C) f32 activated input; output row r uses src rows
    base + r + (k-1)*d for k in {0,1,2}.  w_ref: (3C, C) bf16 with tap-k rows
    at [k*C:(k+1)*C].  Returns (out_len, C) f32 including the bias.
    """
    taps = [src[base + (k - 1) * d: base + (k - 1) * d + out_len, :]
            for k in range(KSIZE)]
    a = jnp.concatenate(taps, axis=-1).astype(jnp.bfloat16)        # (out_len, 3C)
    y = jnp.dot(a, w_ref[...], preferred_element_type=jnp.float32)
    return y + b_ref[...]


def resblock2_kernel(xl_ref, xm_ref, xr_ref, w1_ref, b1_ref, w2_ref, b2_ref,
                     o_ref, xw_ref, *, t_true, t_tile):
    # xl_ref/xr_ref: (1, HALO_FETCH, C) left/right halo slabs
    # xm_ref:        (1, t_tile, C)     main block
    # w*_ref:        (3C, C) bf16       taps stacked on the contraction dim
    # b*_ref:        (1, C)  f32
    # o_ref:         (1, t_tile, C)
    # xw_ref:        (t_tile + 2*HALO_FETCH, C) f32 scratch (stitched window)
    t = pl.program_id(1)
    C = xm_ref.shape[-1]
    H = HALO_FETCH
    Tw = t_tile + 2 * H            # stitched window length
    Tc = t_tile + 2 * HALO         # conv-1 output region (central +- 4)

    # ---- stitch [left halo | main | right halo] into one time window ----
    xw_ref[0:H, :] = xl_ref[0]
    xw_ref[H:H + t_tile, :] = xm_ref[0]
    xw_ref[H + t_tile:Tw, :] = xr_ref[0]

    # Rows whose global time index is outside [0, t_true) must read as zero
    # (PyTorch zero padding + wrapper tile padding).  lrelu(0) == 0.
    row_w = lax.broadcasted_iota(jnp.int32, (Tw, C), 0) + (t * t_tile - H)
    xw = jnp.where((row_w >= 0) & (row_w < t_true), xw_ref[...], 0.0)   # (Tw, C)

    # ---- conv 1: k=3, d=1, over the extended region (Tc rows) + residual ----
    xt1 = _lrelu(xw)
    u = _dilated_conv_im2col(xt1, w1_ref, b1_ref, HALO, DILATIONS[0], Tc)
    u = u + xw[HALO:HALO + Tc, :]

    # conv-2's zero padding: rows of u outside [0, t_true) must be zero.
    row_u = lax.broadcasted_iota(jnp.int32, (Tc, C), 0) + (t * t_tile - HALO)
    u = jnp.where((row_u >= 0) & (row_u < t_true), u, 0.0)

    # ---- conv 2: k=3, d=3, over the central t_tile rows + residual ----
    xt2 = _lrelu(u)
    y = _dilated_conv_im2col(xt2, w2_ref, b2_ref, HALO, DILATIONS[1], t_tile)
    y = y + u[HALO:HALO + t_tile, :]

    o_ref[0] = y.astype(o_ref.dtype)


def resblock2_forward(x_ncw, w1, b1, w2, b2, *, t_tile=None):
    """x_ncw: (B, C, T) like PyTorch; w*: (Cout, Cin, K); b*: (C,)."""
    B, C, T = x_ncw.shape
    if t_tile is None:
        t_tile = min(512, _round_up(T, HALO_FETCH))
    t_tile = max(HALO_FETCH, _round_up(t_tile, HALO_FETCH))
    T_pad = _round_up(T, t_tile)
    n_t = T_pad // t_tile
    nb8 = T_pad // HALO_FETCH          # number of 8-row blocks along time
    hpb = t_tile // HALO_FETCH         # 8-row blocks per tile

    # NCW -> NTC (channels on lanes, time on sublanes) + pad time to the tile.
    x = jnp.transpose(x_ncw, (0, 2, 1))
    x = jnp.pad(x, ((0, 0), (0, T_pad - T), (0, 0)))

    # (Cout, Cin, K) -> (K*Cin, Cout); row block k matches the kernel's tap-k
    # channel concat.  Pre-cast to bf16 for the MXU (accumulation stays f32).
    w1f = jnp.transpose(w1, (2, 1, 0)).reshape(KSIZE * C, C).astype(jnp.bfloat16)
    w2f = jnp.transpose(w2, (2, 1, 0)).reshape(KSIZE * C, C).astype(jnp.bfloat16)
    b1r = b1.reshape(1, C).astype(jnp.float32)
    b2r = b2.reshape(1, C).astype(jnp.float32)

    main_spec = pl.BlockSpec((1, t_tile, C), lambda b, t: (b, t, 0))
    left_spec = pl.BlockSpec(
        (1, HALO_FETCH, C), lambda b, t: (b, jnp.maximum(t * hpb - 1, 0), 0))
    right_spec = pl.BlockSpec(
        (1, HALO_FETCH, C), lambda b, t: (b, jnp.minimum((t + 1) * hpb, nb8 - 1), 0))
    w_spec = pl.BlockSpec((KSIZE * C, C), lambda b, t: (0, 0))     # resident weights
    bias_spec = pl.BlockSpec((1, C), lambda b, t: (0, 0))
    out_spec = pl.BlockSpec((1, t_tile, C), lambda b, t: (b, t, 0))

    kernel = functools.partial(resblock2_kernel, t_true=T, t_tile=t_tile)

    out = pl.pallas_call(
        kernel,
        grid=(B, n_t),
        in_specs=[left_spec, main_spec, right_spec,
                  w_spec, bias_spec, w_spec, bias_spec],
        out_specs=out_spec,
        out_shape=jax.ShapeDtypeStruct((B, T_pad, C), x.dtype),
        scratch_shapes=[pltpu.VMEM((t_tile + 2 * HALO_FETCH, C), jnp.float32)],
        compiler_params=pltpu.CompilerParams(
            dimension_semantics=("parallel", "parallel"),
            vmem_limit_bytes=48 * 1024 * 1024),
    )(x, x, x, w1f, b1r, w2f, b2r)

    out = out[:, :T, :]
    return jnp.transpose(out, (0, 2, 1))       # back to (B, C, T)


if __name__ == "__main__":
    key = jax.random.PRNGKey(0)
    B, C, T = 2, 4, 20
    k1, k2, k3, k4, k5 = jax.random.split(key, 5)

    x = jax.random.normal(k1, (B, C, T), jnp.float32)
    # init_weights in HiFi-GAN: Normal(0, 0.01); weight_norm is identity at init.
    w1 = 0.01 * jax.random.normal(k2, (C, C, KSIZE), jnp.float32)
    w2 = 0.01 * jax.random.normal(k3, (C, C, KSIZE), jnp.float32)
    b1 = 0.01 * jax.random.normal(k4, (C,), jnp.float32)
    b2 = 0.01 * jax.random.normal(k5, (C,), jnp.float32)

    # multi-tile path (3 time tiles, halo stitching + edge/pad masking) ...
    y_tiled = resblock2_forward(x, w1, b1, w2, b2, t_tile=8)
    # ... and the default single-tile path.
    y_default = resblock2_forward(x, w1, b1, w2, b2)
    jax.block_until_ready((y_tiled, y_default))

    # pure-JAX reference (PyTorch-equivalent cross-correlation conv1d, f32)
    def ref_conv(x_ncw, w, b, d):
        y = lax.conv_general_dilated(
            x_ncw, w, window_strides=(1,), padding=[(d, d)],
            rhs_dilation=(d,), dimension_numbers=('NCH', 'OIH', 'NCH'))
        return y + b.reshape(1, C, 1)

    xr = x
    for (w, b, d) in ((w1, b1, DILATIONS[0]), (w2, b2, DILATIONS[1])):
        xt = jnp.where(xr > 0, xr, LRELU_SLOPE * xr)
        xr = ref_conv(xt, w, b, d) + xr

    for y in (y_tiled, y_default):
        assert y.shape == (B, C, T)
        err = float(jnp.max(jnp.abs(y - xr)))
        assert jnp.allclose(y, xr, atol=1e-2, rtol=1e-2), err
    print("KERNEL_OK")
</pallas_src>

<mosaic_0001>
module attributes {stable_mosaic.version = 11 : i64} {
  func.func @resblock2_kernel(%arg0: i32, %arg1: i32, %arg2: memref<1x8x4xf32, #tpu.memory_space<vmem>>, %arg3: memref<1x8x4xf32, #tpu.memory_space<vmem>>, %arg4: memref<1x8x4xf32, #tpu.memory_space<vmem>>, %arg5: memref<12x4xbf16, #tpu.memory_space<vmem>>, %arg6: memref<1x4xf32, #tpu.memory_space<vmem>>, %arg7: memref<12x4xbf16, #tpu.memory_space<vmem>>, %arg8: memref<1x4xf32, #tpu.memory_space<vmem>>, %arg9: memref<1x8x4xf32, #tpu.memory_space<vmem>>, %arg10: memref<24x4xf32, #tpu.memory_space<vmem>>) attributes {dimension_semantics = [#tpu.dimension_semantics<parallel>, #tpu.dimension_semantics<parallel>], iteration_bounds = array<i64: 2, 3>, scalar_prefetch = 0 : i64, scratch_operands = 1 : i64, tpu.core_type = #tpu.core_type<tc>, window_params = [{transform_indices = @transform_0, window_bounds = array<i64: 1, 8, 4>}, {transform_indices = @transform_1, window_bounds = array<i64: 1, 8, 4>}, {transform_indices = @transform_2, window_bounds = array<i64: 1, 8, 4>}, {pipeline_mode = #tpu.pipeline_mode<synchronous>, transform_indices = @transform_3, window_bounds = array<i64: 12, 4>}, {pipeline_mode = #tpu.pipeline_mode<synchronous>, transform_indices = @transform_4, window_bounds = array<i64: 1, 4>}, {pipeline_mode = #tpu.pipeline_mode<synchronous>, transform_indices = @transform_5, window_bounds = array<i64: 12, 4>}, {pipeline_mode = #tpu.pipeline_mode<synchronous>, transform_indices = @transform_6, window_bounds = array<i64: 1, 4>}, {transform_indices = @transform_7, window_bounds = array<i64: 1, 8, 4>}]} {
    %c0 = arith.constant 0 : index
    %c0_0 = arith.constant 0 : index
    %c0_1 = arith.constant 0 : index
    %0 = vector.load %arg2[%c0, %c0_0, %c0_1] : memref<1x8x4xf32, #tpu.memory_space<vmem>>, vector<1x8x4xf32>
    %1 = vector.shape_cast %0 : vector<1x8x4xf32> to vector<8x4xf32>
    %c0_2 = arith.constant 0 : index
    %c0_3 = arith.constant 0 : index
    %2 = vector.load %arg10[%c0_2, %c0_3] : memref<24x4xf32, #tpu.memory_space<vmem>>, vector<8x4xf32>
    tpu.vector_store %arg10[%c0_2, %c0_3], %1 {strides = array<i32>} : memref<24x4xf32, #tpu.memory_space<vmem>>, vector<8x4xf32>,
    %c0_4 = arith.constant 0 : index
    %c0_5 = arith.constant 0 : index
    %c0_6 = arith.constant 0 : index
    %3 = vector.load %arg3[%c0_4, %c0_5, %c0_6] : memref<1x8x4xf32, #tpu.memory_space<vmem>>, vector<1x8x4xf32>
    %4 = vector.shape_cast %3 : vector<1x8x4xf32> to vector<8x4xf32>
    %c8 = arith.constant 8 : index
    %c0_7 = arith.constant 0 : index
    %5 = vector.load %arg10[%c8, %c0_7] : memref<24x4xf32, #tpu.memory_space<vmem>>, vector<8x4xf32>
    tpu.vector_store %arg10[%c8, %c0_7], %4 {strides = array<i32>} : memref<24x4xf32, #tpu.memory_space<vmem>>, vector<8x4xf32>,
    %c0_8 = arith.constant 0 : index
    %c0_9 = arith.constant 0 : index
    %c0_10 = arith.constant 0 : index
    %6 = vector.load %arg4[%c0_8, %c0_9, %c0_10] : memref<1x8x4xf32, #tpu.memory_space<vmem>>, vector<1x8x4xf32>
    %7 = vector.shape_cast %6 : vector<1x8x4xf32> to vector<8x4xf32>
    %c16 = arith.constant 16 : index
    %c0_11 = arith.constant 0 : index
    %8 = vector.load %arg10[%c16, %c0_11] : memref<24x4xf32, #tpu.memory_space<vmem>>, vector<8x4xf32>
    tpu.vector_store %arg10[%c16, %c0_11], %7 {strides = array<i32>} : memref<24x4xf32, #tpu.memory_space<vmem>>, vector<8x4xf32>,
    %9 = tpu.iota {dimensions = array<i32: 0>} : vector<24x4xi32>
    %c8_i32 = arith.constant 8 : i32
    %10 = arith.muli %arg1, %c8_i32 : i32
    %c8_i32_12 = arith.constant 8 : i32
    %11 = arith.subi %10, %c8_i32_12 : i32
    %12 = vector.broadcast %11 : i32 to vector<24x4xi32>
    %13 = arith.addi %9, %12 : vector<24x4xi32>
    %c0_i32 = arith.constant 0 : i32
    %14 = vector.broadcast %c0_i32 : i32 to vector<24x4xi32>
    %15 = arith.cmpi sge, %13, %14 : vector<24x4xi32>
    %c20_i32 = arith.constant 20 : i32
    %16 = vector.broadcast %c20_i32 : i32 to vector<24x4xi32>
    %17 = arith.cmpi slt, %13, %16 : vector<24x4xi32>
    %18 = arith.andi %15, %17 : vector<24x4xi1>
    %c0_13 = arith.constant 0 : index
    %c0_14 = arith.constant 0 : index
    %19 = vector.load %arg10[%c0_13, %c0_14] : memref<24x4xf32, #tpu.memory_space<vmem>>, vector<24x4xf32>
    %cst = arith.constant 0.000000e+00 : f32
    %20 = vector.broadcast %cst : f32 to vector<24x4xf32>
    %21 = arith.select %18, %19, %20 : vector<24x4xi1>, vector<24x4xf32>
    %cst_15 = arith.constant 0.000000e+00 : f32
    %22 = vector.broadcast %cst_15 : f32 to vector<24x4xf32>
    %23 = arith.cmpf ogt, %21, %22 : vector<24x4xf32>
    %cst_16 = arith.constant 1.000000e-01 : f32
    %24 = vector.broadcast %cst_16 : f32 to vector<24x4xf32>
    %25 = arith.mulf %24, %21 : vector<24x4xf32>
    %26 = arith.select %23, %21, %25 : vector<24x4xi1>, vector<24x4xf32>
    %27 = vector.extract_strided_slice %26 {offsets = [3, 0], sizes = [16, 4], strides = [1, 1]} : vector<24x4xf32> to vector<16x4xf32>
    %28 = vector.extract_strided_slice %26 {offsets = [4, 0], sizes = [16, 4], strides = [1, 1]} : vector<24x4xf32> to vector<16x4xf32>
    %29 = vector.extract_strided_slice %26 {offsets = [5, 0], sizes = [16, 4], strides = [1, 1]} : vector<24x4xf32> to vector<16x4xf32>
    %30 = tpu.concatenate %27, %28, %29 in 1 : vector<16x4xf32>, vector<16x4xf32>, vector<16x4xf32> -> vector<16x12xf32>
    %31 = arith.truncf %30 : vector<16x12xf32> to vector<16x12xbf16>
    %c0_17 = arith.constant 0 : index
    %c0_18 = arith.constant 0 : index
    %32 = vector.load %arg5[%c0_17, %c0_18] : memref<12x4xbf16, #tpu.memory_space<vmem>>, vector<12x4xbf16>
    %cst_19 = arith.constant dense<0.000000e+00> : vector<16x4xf32>
    %33 = tpu.matmul %31, %32, %cst_19 {dimension_numbers = #tpu.dot_dimension_numbers<[1], [0], [0], [1], [0, 0, 1, 1], [], []>} : vector<16x12xbf16>, vector<12x4xbf16>, vector<16x4xf32> -> vector<16x4xf32>
    %c0_20 = arith.constant 0 : index
    %c0_21 = arith.constant 0 : index
    %34 = vector.load %arg6[%c0_20, %c0_21] : memref<1x4xf32, #tpu.memory_space<vmem>>, vector<1x4xf32>
    %35 = vector.broadcast %34 : vector<1x4xf32> to vector<16x4xf32>
    %36 = arith.addf %33, %35 : vector<16x4xf32>
    %37 = vector.extract_strided_slice %21 {offsets = [4, 0], sizes = [16, 4], strides = [1, 1]} : vector<24x4xf32> to vector<16x4xf32>
    %38 = arith.addf %36, %37 : vector<16x4xf32>
    %39 = tpu.iota {dimensions = array<i32: 0>} : vector<16x4xi32>
    %c8_i32_22 = arith.constant 8 : i32
    %40 = arith.muli %arg1, %c8_i32_22 : i32
    %c4_i32 = arith.constant 4 : i32
    %41 = arith.subi %40, %c4_i32 : i32
    %42 = vector.broadcast %41 : i32 to vector<16x4xi32>
    %43 = arith.addi %39, %42 : vector<16x4xi32>
    %c0_i32_23 = arith.constant 0 : i32
    %44 = vector.broadcast %c0_i32_23 : i32 to vector<16x4xi32>
    %45 = arith.cmpi sge, %43, %44 : vector<16x4xi32>
    %c20_i32_24 = arith.constant 20 : i32
    %46 = vector.broadcast %c20_i32_24 : i32 to vector<16x4xi32>
    %47 = arith.cmpi slt, %43, %46 : vector<16x4xi32>
    %48 = arith.andi %45, %47 : vector<16x4xi1>
    %cst_25 = arith.constant 0.000000e+00 : f32
    %49 = vector.broadcast %cst_25 : f32 to vector<16x4xf32>
    %50 = arith.select %48, %38, %49 : vector<16x4xi1>, vector<16x4xf32>
    %cst_26 = arith.constant 0.000000e+00 : f32
    %51 = vector.broadcast %cst_26 : f32 to vector<16x4xf32>
    %52 = arith.cmpf ogt, %50, %51 : vector<16x4xf32>
    %cst_27 = arith.constant 1.000000e-01 : f32
    %53 = vector.broadcast %cst_27 : f32 to vector<16x4xf32>
    %54 = arith.mulf %53, %50 : vector<16x4xf32>
    %55 = arith.select %52, %50, %54 : vector<16x4xi1>, vector<16x4xf32>
    %56 = vector.extract_strided_slice %55 {offsets = [1, 0], sizes = [8, 4], strides = [1, 1]} : vector<16x4xf32> to vector<8x4xf32>
    %57 = vector.extract_strided_slice %55 {offsets = [4, 0], sizes = [8, 4], strides = [1, 1]} : vector<16x4xf32> to vector<8x4xf32>
    %58 = vector.extract_strided_slice %55 {offsets = [7, 0], sizes = [8, 4], strides = [1, 1]} : vector<16x4xf32> to vector<8x4xf32>
    %59 = tpu.concatenate %56, %57, %58 in 1 : vector<8x4xf32>, vector<8x4xf32>, vector<8x4xf32> -> vector<8x12xf32>
    %60 = arith.truncf %59 : vector<8x12xf32> to vector<8x12xbf16>
    %c0_28 = arith.constant 0 : index
    %c0_29 = arith.constant 0 : index
    %61 = vector.load %arg7[%c0_28, %c0_29] : memref<12x4xbf16, #tpu.memory_space<vmem>>, vector<12x4xbf16>
    %cst_30 = arith.constant dense<0.000000e+00> : vector<8x4xf32>
    %62 = tpu.matmul %60, %61, %cst_30 {dimension_numbers = #tpu.dot_dimension_numbers<[1], [0], [0], [1], [0, 0, 1, 1], [], []>} : vector<8x12xbf16>, vector<12x4xbf16>, vector<8x4xf32> -> vector<8x4xf32>
    %c0_31 = arith.constant 0 : index
    %c0_32 = arith.constant 0 : index
    %63 = vector.load %arg8[%c0_31, %c0_32] : memref<1x4xf32, #tpu.memory_space<vmem>>, vector<1x4xf32>
    %64 = vector.broadcast %63 : vector<1x4xf32> to vector<8x4xf32>
    %65 = arith.addf %62, %64 : vector<8x4xf32>
    %66 = vector.extract_strided_slice %50 {offsets = [4, 0], sizes = [8, 4], strides = [1, 1]} : vector<16x4xf32> to vector<8x4xf32>
    %67 = arith.addf %65, %66 : vector<8x4xf32>
    %c0_33 = arith.constant 0 : index
    %c0_34 = arith.constant 0 : index
    %c0_35 = arith.constant 0 : index
    %68 = vector.load %arg9[%c0_33, %c0_34, %c0_35] : memref<1x8x4xf32, #tpu.memory_space<vmem>>, vector<1x8x4xf32>
    %69 = vector.shape_cast %68 : vector<1x8x4xf32> to vector<8x4xf32>
    %70 = vector.shape_cast %67 : vector<8x4xf32> to vector<1x8x4xf32>
    tpu.vector_store %arg9[%c0_33, %c0_34, %c0_35], %70 {strides = array<i32>} : memref<1x8x4xf32, #tpu.memory_space<vmem>>, vector<1x8x4xf32>,
    return
  }
  func.func @transform_0(%arg0: i32, %arg1: i32) -> (i32, i32, i32) {
    %c1_i32 = arith.constant 1 : i32
    %0 = arith.muli %arg1, %c1_i32 : i32
    %c1_i32_0 = arith.constant 1 : i32
    %1 = arith.subi %0, %c1_i32_0 : i32
    %c0_i32 = arith.constant 0 : i32
    %2 = arith.maxsi %1, %c0_i32 : i32
    %c0_i32_1 = arith.constant 0 : i32
    %c0_i32_2 = arith.constant 0 : i32
    return %arg0, %2, %c0_i32_1 : i32, i32, i32
  }
  func.func @transform_1(%arg0: i32, %arg1: i32) -> (i32, i32, i32) {
    %c0_i32 = arith.constant 0 : i32
    %c0_i32_0 = arith.constant 0 : i32
    return %arg0, %arg1, %c0_i32 : i32, i32, i32
  }
  func.func @transform_2(%arg0: i32, %arg1: i32) -> (i32, i32, i32) {
    %c1_i32 = arith.constant 1 : i32
    %0 = arith.addi %arg1, %c1_i32 : i32
    %c1_i32_0 = arith.constant 1 : i32
    %1 = arith.muli %0, %c1_i32_0 : i32
    %c2_i32 = arith.constant 2 : i32
    %2 = arith.minsi %1, %c2_i32 : i32
    %c0_i32 = arith.constant 0 : i32
    %c0_i32_1 = arith.constant 0 : i32
    return %arg0, %2, %c0_i32 : i32, i32, i32
  }
  func.func @transform_3(%arg0: i32, %arg1: i32) -> (i32, i32) {
    %c0_i32 = arith.constant 0 : i32
    %c0_i32_0 = arith.constant 0 : i32
    %c0_i32_1 = arith.constant 0 : i32
    return %c0_i32, %c0_i32_0 : i32, i32
  }
  func.func @transform_4(%arg0: i32, %arg1: i32) -> (i32, i32) {
    %c0_i32 = arith.constant 0 : i32
    %c0_i32_0 = arith.constant 0 : i32
    %c0_i32_1 = arith.constant 0 : i32
    return %c0_i32, %c0_i32_0 : i32, i32
  }
  func.func @transform_5(%arg0: i32, %arg1: i32) -> (i32, i32) {
    %c0_i32 = arith.constant 0 : i32
    %c0_i32_0 = arith.constant 0 : i32
    %c0_i32_1 = arith.constant 0 : i32
    return %c0_i32, %c0_i32_0 : i32, i32
  }
  func.func @transform_6(%arg0: i32, %arg1: i32) -> (i32, i32) {
    %c0_i32 = arith.constant 0 : i32
    %c0_i32_0 = arith.constant 0 : i32
    %c0_i32_1 = arith.constant 0 : i32
    return %c0_i32, %c0_i32_0 : i32, i32
  }
  func.func @transform_7(%arg0: i32, %arg1: i32) -> (i32, i32, i32) {
    %c0_i32 = arith.constant 0 : i32
    %c0_i32_0 = arith.constant 0 : i32
    return %arg0, %arg1, %c0_i32 : i32, i32, i32
  }
}

</mosaic_0001>

<bundles_post_ra>
// kernel: tpu_custom_call.1
= control target key start
LH: loop header
LB: loop body
LE: loop exit
PB: predicated region body
PF: predicated region fallthrough
CT: control target
= control target key end

     0   :  { %s959_s24 = smov 0   ;;  %s961_s25 = smov 0   ;;  %s1114_s0 = inlined_call_operand.vmem [shape: f32[2,24,4], index: 0, kind: input, shape index: {}]   ;;  %s1115_s1 = inlined_call_operand.vmem [shape: f32[2,24,4], index: 1, kind: input, shape index: {}]   ;;  %s1116_s2 = inlined_call_operand.vmem [shape: f32[2,24,4], index: 2, kind: input, shape index: {}]   ;;  %s1117_s3 = inlined_call_operand.vmem [shape: bf16[12,4], index: 3, kind: input, shape index: {}]   ;;  %s1118_s4 = inlined_call_operand.vmem [shape: f32[1,4], index: 4, kind: input, shape index: {}]   ;;  %s1119_s5 = inlined_call_operand.vmem [shape: bf16[12,4], index: 5, kind: input, shape index: {}]   ;;  %s1120_s6 = inlined_call_operand.vmem [shape: f32[1,4], index: 6, kind: input, shape index: {}]   ;;  %s1121_s7 = inlined_call_operand.vmem [shape: f32[2,24,4], index: 7, kind: output, shape index: {}]  }
   0x1   :  { %s963_s26 = smov 0   ;;  %s965_s27 = smov 0  }
   0x2   :  { %s967_s28 = smov 0  }
   0x3 LB: > { %s26_s29 = sadd.s32 1, %s907_s26  ;;  %s29_s30 = sadd.s32 1, %s911_s27  ;;  %s915_s28 = sphi %s967_s28, %s17_s28   ;;  %s911_s27 = sphi %s965_s27, %s1126_s27   ;;  %s907_s26 = sphi %s963_s26, %s1125_s26   ;;  %s903_s25 = sphi %s961_s25, %s1124_s25   ;;  %s899_s24 = sphi %s959_s24, %s1123_s24  }
   0x4   : > { %p27_p0 = scmp.ge.s32.totalorder %s26_s29, 3  ;;  %p779_p1 = scmp.ge.s32.totalorder %s915_s28, 1 }
   0x5   : > { %p310_p2 = scmp.lt.s32.totalorder %s915_s28, 7 }
   0x6   : > { %s1128_s29 = smov (%p27_p0, %s26_s29), 0  ;;  %s1130_s30 = smov (!%p27_p0, %s29_s30), %s911_s27 }
   0x7   : > { %p311_p3 = pnand %p779_p1, %p310_p2  ;;  %p31_p4 = scmp.ge.s32.totalorder %s1130_s30, 2 }
   0x8   : > { %s780_s8 = sadd.s32 (!%p311_p3), 4294967295, %s899_s24  ;;  %p373_p5 = scmp.lt.s32.totalorder (!%p311_p3), %s903_s25, 1 }
   0x9   : > { %s1132_s30 = smov (%p31_p4, %s1130_s30), 0  ;;  %314 = sbr.rel (%p311_p3) target bundleno = 568 (0x238), region = 48 }
   0xa   : > { %p371_p6 = scmp.gt.s32.totalorder (!%p311_p3), %s780_s8, 0  ;;  %p781_p7 = scmp.lt.s32.totalorder (!%p311_p3), %s780_s8, 2 }
   0xb   : > { %p386_p8 = scmp.lt.s32.totalorder (!%p311_p3), %s899_s24, 2  ;;  %s392_s12 = sadd.s32 (!%p311_p3), 1, %s899_s24 }
   0xc   : > { %p1006_p9 = scmp.lt.s32.totalorder (!%p311_p3), %s392_s12, 2  ;;  %s793_s23 = sshll.u32 (!%p311_p3), %s899_s24, 3 }
   0xd   : > { %s800_s20 = sadd.s32 (!%p311_p3), 4294967292, %s793_s23 }
   0xe   : > { %s1134_s25 = smov (!%p373_p5, %s903_s25), 1  ;;  %s1136_s8 = smov (!%p371_p6, %s780_s8), 0  ;;  %v422_v0 = vlaneseq  ;;  %vm416_vm0 = vcmask 31744   ;;  %vm459_vm13 = vcmask 1046528   ;;  %vm474_vm14 = vcmask 1045504  }
   0xf   : > { %s812_s9 = smul.u32 3, %s1134_s25  ;;  %s1138_s8 = smov (!%p781_p7, %s1136_s8), 2  ;;  %v797_v35 = vld [vmem:[%s1117_s3] sm:$0xf]  ;;  %v810_v36 = vld [vmem:[%s1117_s3] sm:$0x30] }
  0x10   : > { %s387_s10 = scalar_select %p386_p8, %s899_s24, 2  ;;  %v995_v1 = vshrl.u32 %v422_v0, 7  ;;  %v798_v37 = vor.u32 %v810_v36, %v797_v35  ;;  %vm492_vm15 = vcmask 64512   ;;  %v811_v35 = vld [vmem:[%s1119_s5] sm:$0x30] }
  0x11   : > { %s378_s11 = sadd.s32 %s812_s9, %s1138_s8  ;;  %s1140_s12 = smov (!%p1006_p9, %s392_s12), 2 }
  0x12   : > { %s786_s13 = sshll.u32 %s378_s11, 3  ;;  %s389_s14 = sadd.s32 %s812_s9, %s387_s10  ;;  %v1012_v4 = vadd.s32 8, %v995_v1  ;;  %v425_v5 = vadd.s32 16, %v995_v1  ;;  %v532_v38 = vsel %vm474_vm14, %v798_v37, 0 }
  0x13   : > { %s380_s17 = scalar_lea.vmem %s1114_s0, %s786_s13  ;;  %s1000_s18 = sshll.u32 %s389_s14, 3  ;;  %541 = vmatpush.bf16.msra.mxu0 %v532_v38 }
  0x14   : > { %s391_s21 = scalar_lea.vmem %s1115_s1, %s1000_s18  ;;  %v415_v2 = vld [vmem:[%s380_s17] sm:$0xff]  ;;  %s794_s25 = sadd.s32 4294967288, %s793_s23 }
  0x15   : > { %417 = vst.msk [vmem:[#allocation2] sm:$0xff] %vm416_vm0, %v415_v2  ;;  %v418_v3 = vld [vmem:[%s391_s21] sm:$0xff]  ;;  %s1142_s12 = smov (!%p1006_p9, %s1140_s12), 2  ;;  %v428_v6 = vstv %s794_s25 }
  0x16   : > { %419 = vst.msk [vmem:[#allocation2 + $0x8] sm:$0xff] %vm416_vm0, %v418_v3  ;;  %v429_v7 = vadd.s32 %v428_v6, %v995_v1  ;;  %v430_v8 = vadd.s32 %v428_v6, %v1012_v4  ;;  %s400_s8 = sadd.s32 %s812_s9, %s1142_s12  ;;  %v431_v9 = vadd.s32 %v428_v6, %v425_v5  ;;  %s917_s9 = smov 4   ;;  %v562_v3 = vstv %s800_s20 }
  0x17   : > { %s791_s10 = sshll.u32 %s400_s8, 3  ;;  %s918_s12 = smov 8  }
  0x18   : > { %vm432_vm1 = vcmp.ge.s32.totalorder %v429_v7, 0  ;;  %vm433_vm2 = vcmp.ge.s32.totalorder %v430_v8, 0  ;;  %vm435_vm3 = vcmp.lt.s32.totalorder %v429_v7, 20  ;;  %s402_s14 = scalar_lea.vmem %s1116_s2, %s791_s10  ;;  %vm436_vm4 = vcmp.lt.s32.totalorder %v430_v8, 20  ;;  %v875_v7 = vld [vmem:[%s1118_s4] ss:$0 sm:$0xff] }
  0x19   : > { %vm438_vm5 = vmand %vm432_vm1, %vm435_vm3  ;;  %v420_v11 = vld [vmem:[%s402_s14] sm:$0xff]  ;;  %vm434_vm8 = vcmp.ge.s32.totalorder %v431_v9, 0  ;;  %vm437_vm9 = vcmp.lt.s32.totalorder %v431_v9, 20  ;;  %vm504_vm1 = vsmask.f32 6400  ;;  %vm551_vm3 = vcmask 1043456  }
  0x1a   : > { %vm439_vm6 = vmand %vm433_vm2, %vm436_vm4  ;;  %421 = vst.msk [vmem:[#allocation2 + $0x10] sm:$0xff] %vm416_vm0, %v420_v11  ;;  %vm527_vm2 = vcmask 97280   ;;  %v563_v8 = vadd.s32 %v562_v3, %v995_v1 }
  0x1b   : > { %vm440_vm11 = vmand %vm434_vm8, %vm437_vm9 }
  0x1c   : > { %v441_v10 = vld [vmem:[#allocation2] sm:$0xff]  ;;  %vm565_vm4 = vcmp.ge.s32.totalorder %v563_v8, 0 }
  0x1d   : > { %v442_v12 = vld [vmem:[#allocation2 + $0x8] sm:$0xff]  ;;  %v1028_v13 = vsel %vm438_vm5, %v441_v10, 0.0  ;;  %vm567_vm5 = vcmp.lt.s32.totalorder %v563_v8, 20 }
  0x1e   : > { %v1031_v14 = vsel %vm439_vm6, %v442_v12, 0.0  ;;  %v450_v15 = vmul.f32 0.1, %v1028_v13  ;;  %vm447_vm7 = vcmp.gt.f32.partialorder %v1028_v13, 0.0  ;;  %v552_v5 = vrot.slane %v1028_v13, 4  ;;  %vm569_vm6 = vmand %vm565_vm4, %vm567_vm5 }
  0x1f   : > { %v451_v16 = vmul.f32 0.1, %v1031_v14  ;;  %vm448_vm10 = vcmp.gt.f32.partialorder %v1031_v14, 0.0  ;;  %v553_v6 = vrot.slane %v1031_v14, 4 }
  0x20   : > { %v453_v17 = vsel %vm447_vm7, %v1028_v13, %v450_v15  ;;  %v564_v15 = vadd.s32 %v562_v3, %v1012_v4 }
  0x21   : > { %v454_v18 = vsel %vm448_vm10, %v1031_v14, %v451_v16  ;;  %v443_v19 = vld [vmem:[#allocation2 + $0x10] sm:$0xff]  ;;  %v460_v20 = vrot.slane %v453_v17, 1  ;;  %v475_v23 = vrot.slane %v453_v17, 2  ;;  %v554_v10 = vsel %vm551_vm3, %v552_v5, %v553_v6 }
  0x22   : > { %v1039_v21 = vsel %vm440_vm11, %v443_v19, 0.0  ;;  %v461_v22 = vrot.slane %v454_v18, 1  ;;  %v476_v24 = vrot.slane %v454_v18, 2  ;;  %vm566_vm7 = vcmp.ge.s32.totalorder %v564_v15, 0 }
  0x23   : > { %vm449_vm12 = vcmp.gt.f32.partialorder %v1039_v21, 0.0  ;;  %v452_v25 = vmul.f32 0.1, %v1039_v21  ;;  %v555_v13 = vrot.slane %v1039_v21, 4  ;;  %vm568_vm8 = vcmp.lt.s32.totalorder %v564_v15, 20 }
  0x24   : > { %v462_v27 = vsel %vm459_vm13, %v460_v20, %v461_v22  ;;  %v477_v29 = vsel %vm474_vm14, %v475_v23, %v476_v24  ;;  %vm570_vm9 = vmand %vm566_vm7, %vm568_vm8 }
  0x25   : > { %v455_v26 = vsel %vm449_vm12, %v1039_v21, %v452_v25  ;;  %vm581_vm12 = vcmask 1044480  }
  0x26   : > { %v463_v28 = vrot.slane %v455_v26, 1  ;;  %v478_v30 = vrot.slane %v455_v26, 2 }
  0x28   : > { %v464_v31 = vsel %vm459_vm13, %v461_v22, %v463_v28  ;;  %v479_v32 = vsel %vm474_vm14, %v476_v24, %v478_v30  ;;  %vm591_vm13 = vcmask 1041408  }
  0x29   : > { %v855_v33 = vpack.i.bf16 %v464_v31, %v462_v27  ;;  %v860_v34 = vpack.i.bf16 %v479_v32, %v477_v29 }
  0x2b   : > { %856 = vrot.lane.b32.xlu0 %v855_v33, %s917_s9  ;;  %861 = vrot.lane.b32.xlu1 %v860_v34, %s918_s12  ;;  %v803_v34 = vld [vmem:[%s1119_s5] sm:$0xf] }
  0x2c   : > { %v804_v36 = vor.u32 %v811_v35, %v803_v34 }
  0x2e   : > { %v628_v37 = vsel %vm474_vm14, %v804_v36, 0 }
  0x2f   : > { %637 = vmatpush.bf16.msra.mxu1 %v628_v37 }
  0x33   : > { %469 = vrot.lane.b32.xlu0 %v463_v28, %s917_s9  ;;  %484 = vrot.lane.b32.xlu1 %v478_v30, %s918_s12 }
  0x9d   : > { %v857_v39 = vpop.permute.xlu0 %856  ;;  %v862_v40 = vpop.permute.xlu1 %861 }
  0x9e   : > { %v859_v41 = vunpack.i.h.bf16 %v857_v39  ;;  %v858_v42 = vunpack.i.l.bf16 %v857_v39  ;;  %v864_v43 = vunpack.i.h.bf16 %v862_v40  ;;  %v863_v44 = vunpack.i.l.bf16 %v862_v40 }
  0xa0   : > { %v490_v45 = vsel %vm416_vm0, %v454_v18, %v859_v41  ;;  %v489_v46 = vsel %vm416_vm0, %v453_v17, %v858_v42  ;;  %v556_v17 = vsel %vm551_vm3, %v553_v6, %v555_v13 }
  0xa1   : > { %v493_v47 = vsel %vm492_vm15, %v489_v46, %v863_v44  ;;  %v494_v48 = vsel %vm492_vm15, %v490_v45, %v864_v43 }
  0xa2   : > { %v496_v49 = vpack.c.bf16 %v494_v48, %v493_v47 }
  0xa4   : > { %v506_v53 = vshrl.u32 %v496_v49, 16  ;;  %v509_v54 = vshll.u32 %v496_v49, 16 }
  0xa5   : > { %v470_v50 = vpop.permute.xlu0 %469  ;;  %v485_v51 = vpop.permute.xlu1 %484 }
  0xa6   : > { %v491_v52 = vsel %vm416_vm0, %v455_v26, %v470_v50  ;;  %v508_v59 = vrot.slane %v506_v53, 1  ;;  %v511_v60 = vrot.slane %v509_v54, 2  ;;  %v876_v53 = vld [vmem:[%s1120_s6] ss:$0 sm:$0xff] }
  0xa7   : > { %v495_v55 = vsel %vm492_vm15, %v491_v52, %v485_v51 }
  0xa8   : > { %v497_v56 = vpack.c.bf16 %v495_v55, %v495_v55  ;;  %v512_v63 = vor.u32 %v511_v60, %v508_v59 }
  0xaa   : > { %v514_v57 = vshrl.u32 %v497_v56, 16  ;;  %v517_v58 = vshll.u32 %v497_v56, 16 }
  0xac   : > { %v516_v61 = vrot.slane %v514_v57, 1  ;;  %v519_v62 = vrot.slane %v517_v58, 2 }
  0xae   : > { %v520_v0 = vor.u32 %v519_v62, %v516_v61 }
  0xb0   : > { %v521_v2 = vsel %vm504_vm1, %v512_v63, %v520_v0 }
  0xb1   : > { %799 = vmatmul.msk.bf16.vlgmr.msra.gmra.mxu0 %vm527_vm2, %v521_v2 }
 0x12e   : > { %v543_v9 = vpop.f32.mrf.mxu0 }
 0x12f   : > { %v544_v11 = vadd.f32 %v875_v7, %v543_v9 }
 0x131   : > { %v559_v12 = vadd.f32 %v554_v10, %v544_v11 }
 0x133   : > { %v571_v14 = vsel %vm569_vm6, %v559_v12, 0.0 }
 0x134   : > { %v575_v1 = vmul.f32 0.1, %v571_v14  ;;  %vm573_vm10 = vcmp.gt.f32.partialorder %v571_v14, 0.0  ;;  %v645_v22 = vrot.slane %v571_v14, 4 }
 0x136   : > { %v545_v16 = vpop.f32.mrf.mxu0  ;;  %v577_v23 = vsel %vm573_vm10, %v571_v14, %v575_v1 }
 0x137   : > { %v546_v18 = vadd.f32 %v875_v7, %v545_v16  ;;  %v582_v26 = vrot.slane %v577_v23, 3  ;;  %v592_v31 = vrot.slane %v577_v23, 6 }
 0x139   : > { %v560_v19 = vadd.f32 %v556_v17, %v546_v18 }
 0x13b   : > { %v572_v20 = vsel %vm570_vm9, %v560_v19, 0.0 }
 0x13c   : > { %v576_v24 = vmul.f32 0.1, %v572_v20  ;;  %vm574_vm11 = vcmp.gt.f32.partialorder %v572_v20, 0.0  ;;  %v646_v4 = vrot.slane %v572_v20, 4 }
 0x13e   : > { %v578_v25 = vsel %vm574_vm11, %v572_v20, %v576_v24  ;;  %v647_v21 = vsel %vm551_vm3, %v645_v22, %v646_v4 }
 0x13f   : > { %v583_v27 = vrot.slane %v578_v25, 3  ;;  %v593_v30 = vrot.slane %v578_v25, 6 }
 0x141   : > { %v584_v28 = vsel %vm581_vm12, %v582_v26, %v583_v27  ;;  %v594_v32 = vsel %vm591_vm13, %v592_v31, %v593_v30 }
 0x142   : > { %v865_v29 = vpack.i.bf16 %v583_v27, %v584_v28  ;;  %v870_v33 = vpack.i.bf16 %v593_v30, %v594_v32 }
 0x144   : > { %866 = vrot.lane.b32.xlu2 %v865_v29, %s917_s9  ;;  %s413_s9 = scalar_lea.vmem %s1121_s7, %s1000_s18 }
 0x14c   : > { %871 = vrot.lane.b32.xlu2 %v870_v33, %s918_s12 }
 0x19e   : > { %v867_v38 = vpop.permute.xlu2 %866 }
 0x19f   : > { %v869_v39 = vunpack.i.h.bf16 %v867_v38  ;;  %v868_v40 = vunpack.i.l.bf16 %v867_v38 }
 0x1a1   : > { %v602_v44 = vsel %vm416_vm0, %v578_v25, %v869_v39  ;;  %v601_v45 = vsel %vm416_vm0, %v577_v23, %v868_v40 }
 0x1a6   : > { %v872_v41 = vpop.permute.xlu2 %871 }
 0x1a7   : > { %v874_v42 = vunpack.i.h.bf16 %v872_v41  ;;  %v873_v43 = vunpack.i.l.bf16 %v872_v41 }
 0x1a9   : > { %v603_v46 = vsel %vm492_vm15, %v601_v45, %v873_v43  ;;  %v604_v47 = vsel %vm492_vm15, %v602_v44, %v874_v42 }
 0x1aa   : > { %v605_v48 = vpack.c.bf16 %v604_v47, %v603_v46 }
 0x1ac   : > { %v615_v49 = vshll.u32 %v605_v48, 16  ;;  %v613_v50 = vshrl.u32 %v605_v48, 16 }
 0x1ae   : > { %v617_v51 = vrot.slane %v615_v49, 1 }
 0x1b0   : > { %v618_v52 = vor.u32 %v617_v51, %v613_v50 }
 0x1b2   : > { %805 = vmatmul.msk.bf16.vlgmr.msra.gmra.mxu1 %vm527_vm2, %v618_v52 }
 0x22f   : > { %v639_v54 = vpop.f32.mrf.mxu1 }
 0x230   : > { %v640_v55 = vadd.f32 %v876_v53, %v639_v54 }
 0x232   : > { %v649_v56 = vadd.f32 %v647_v21, %v640_v55 }
 0x234   : > { %650 = vst.msk [vmem:[%s413_s9] sm:$0xff] %vm416_vm0, %v649_v56 }
 0x237   : > { %v641_v57 = vpop.f32.mrf.mxu1 }
 0x238 PF: > { %s17_s28 = sadd.s32 1, %s915_s28   ;;  %s1123_s24 = smov %s907_s26 }
 0x239   : > { %p14_p10 = scmp.ge.s32.totalorder %s17_s28, 8   ;;  %s1124_s25 = smov %s911_s27 }
 0x23a   : > { %s1125_s26 = smov %s1128_s29  ;;  %s1126_s27 = smov %s1132_s30 }
 0x23b   :  { %16 = sbr.rel (!%p14_p10) target bundleno = 3 (0x3), region = 84 }

</bundles_post_ra>
